<compile_context>
chip_gen: v7x
topology: tpu7x:2x2x1
jax: 0.10.0
libtpu: 0.0.40
codegen_flags: <defaults>
</compile_context>

<pallas_src>
import math

import jax
import jax.numpy as jnp
from jax.experimental import pallas as pl
from jax.experimental.pallas import tpu as pltpu


# ---------------------------------------------------------------------------
# Kernel
# ---------------------------------------------------------------------------
def _fused_linear_kernel(x_ref, wt_ref, scale_ref, bias_ref, o_ref, acc_ref):
    """One (tm, tn) output tile; K is reduced along grid axis 2 ('arbitrary')."""
    k = pl.program_id(2)

    @pl.when(k == 0)
    def _():
        acc_ref[...] = jnp.zeros_like(acc_ref)

    # bf16 x bf16 -> f32 accumulation on the MXU; weight arrives pre-transposed.
    acc_ref[...] += jnp.dot(x_ref[...], wt_ref[...],
                            preferred_element_type=jnp.float32)

    @pl.when(k == pl.num_programs(2) - 1)
    def _():
        # Fused epilogue: per-output-channel scale + bias, one lane-dense store.
        out = acc_ref[...] * scale_ref[...] + bias_ref[...]  # (tm,tn)*(1,tn)+(1,tn)
        o_ref[...] = out.astype(o_ref.dtype)


# ---------------------------------------------------------------------------
# Chip / tiling helpers
# ---------------------------------------------------------------------------
def _round_up(v, m):
    return ((v + m - 1) // m) * m


def _chip_config():
    """(prefer_256, two_cores, vmem_capacity_bytes) — conservative on failure."""
    kind = ""
    try:
        kind = jax.devices()[0].device_kind.lower()
    except Exception:
        pass
    two_cores = ("7" in kind) or (kind == "")          # v7x: 2 TCs / chip
    prefer_256 = not any(g in kind for g in ("v2", "v3", "v4", "v5"))
    try:
        vmem_cap = int(pltpu.get_tpu_info().vmem_capacity_bytes)
    except Exception:
        vmem_cap = (64 << 20) if "7" in kind else (128 << 20)
    return prefer_256, two_cores, vmem_cap


def _vmem_footprint(tm, tn, tk, in_bytes, out_bytes, w_bufs=2):
    return (2 * tm * tk * in_bytes           # x tiles (double-buffered)
            + w_bufs * tk * tn * in_bytes    # weight.T tiles
            + 2 * tm * tn * out_bytes        # output tiles (double-buffered)
            + tm * tn * 4                    # f32 accumulator scratch
            + 2 * 2 * tn * 4)                # scale + bias rows


def _select_tiles(mp, np_, kp, *, in_bytes, out_bytes, prefer_256,
                  vmem_budget, allow_2048, two_cores):
    """Pick the largest 128/256-aligned tiles that fit the VMEM budget."""
    tm_cands = [c for c in (1024, 512, 256, 128, 64, 32, 16)
                if c <= mp and mp % c == 0] or [mp]
    tn_base = (1024, 512, 256, 128) if prefer_256 else (512, 256, 128)
    tn_cands = [c for c in tn_base if c <= np_ and np_ % c == 0] or [np_]
    tk_base = (2048, 1024, 512, 256, 128) if allow_2048 else (1024, 512, 256, 128)
    tk_cands = [c for c in tk_base if c <= kp and kp % c == 0] or [kp]

    tm, tn, tk = tm_cands[-1], tn_cands[-1], tk_cands[-1]
    found = False
    for cn in tn_cands:
        for cm in tm_cands:
            for ck in tk_cands:
                if _vmem_footprint(cm, cn, ck, in_bytes, out_bytes) <= vmem_budget:
                    tm, tn, tk = cm, cn, ck
                    found = True
                    break
            if found:
                break
        if found:
            break

    # v7x: make sure both TensorCores get at least one parallel (M,N) block.
    if two_cores:
        while (mp // tm) * (np_ // tn) < 2:
            if tn >= 256:
                tn //= 2
            elif tm >= 32:
                tm //= 2
            else:
                break
    return tm, tn, tk


# ---------------------------------------------------------------------------
# Per-layer preparation (hoisted out of the hot path)
# ---------------------------------------------------------------------------
def prepare_fused_linear(weight, scale=None, bias=None, *,
                         compute_dtype=jnp.bfloat16):
    """One-time per-layer prep: cast + transpose + pad the weight.

    weight: (out_features, in_features)   -> w_t:       (Kp, Np) compute_dtype
    scale:  (out_features,) or None       -> scale_row: (1, Np) f32 (ones if None)
    bias:   (out_features,) or None       -> bias_row:  (1, Np) f32 (zeros if None)
    Kp / Np are in/out features rounded up to multiples of 128 (zero-padded,
    numerically free for the matmul; padded output columns are sliced off).
    """
    out_f, in_f = weight.shape
    np_ = _round_up(out_f, 128)
    kp = _round_up(in_f, 128)

    w_t = jnp.asarray(weight, compute_dtype).T                     # (K, N)
    if (kp, np_) != (in_f, out_f):
        w_t = jnp.pad(w_t, ((0, kp - in_f), (0, np_ - out_f)))

    s = (jnp.ones((out_f,), jnp.float32) if scale is None
         else jnp.asarray(scale, jnp.float32))
    b = (jnp.zeros((out_f,), jnp.float32) if bias is None
         else jnp.asarray(bias, jnp.float32))
    if np_ != out_f:
        s = jnp.pad(s, (0, np_ - out_f))
        b = jnp.pad(b, (0, np_ - out_f))
    return w_t, s.reshape(1, np_), b.reshape(1, np_)


# ---------------------------------------------------------------------------
# Hot path
# ---------------------------------------------------------------------------
def fused_linear_prepared(x, w_t, scale_row, bias_row, out_features, *,
                          compute_dtype=jnp.bfloat16, out_dtype=None,
                          tm=None, tn=None, tk=None):
    """FusedLinear.forward with a pre-prepared (Kp, Np) weight.

    NOTE: operands are computed in `compute_dtype` (default bf16) on the MXU
    with f32 accumulation; this is an explicit knob (pass jnp.float32 for full
    f32 numerics at ~1/4 MXU throughput).
    """
    kp, np_ = w_t.shape
    in_f = x.shape[-1]
    assert in_f <= kp, "x feature dim larger than prepared weight"
    lead = x.shape[:-1]
    out_dtype = out_dtype or x.dtype

    in_bytes = jnp.dtype(compute_dtype).itemsize
    out_bytes = jnp.dtype(out_dtype).itemsize

    x2 = x.reshape(-1, in_f).astype(compute_dtype)
    m = x2.shape[0]
    m_align = 16 if in_bytes <= 2 else 8       # bf16 packs 2 rows / sublane
    pad_m = (-m) % m_align
    pad_k = kp - in_f
    if pad_m or pad_k:
        x2 = jnp.pad(x2, ((0, pad_m), (0, pad_k)))
    mp = m + pad_m

    prefer_256, two_cores, vmem_cap = _chip_config()
    vmem_budget = (vmem_cap * 3) // 4          # ~96 MiB v5e/v6e, ~48 MiB v7x
    atm, atn, atk = _select_tiles(
        mp, np_, kp, in_bytes=in_bytes, out_bytes=out_bytes,
        prefer_256=prefer_256, vmem_budget=vmem_budget,
        allow_2048=vmem_cap > (64 << 20), two_cores=two_cores)
    tm = tm or atm
    tn = tn or atn
    tk = tk or atk

    grid = (mp // tm, np_ // tn, kp // tk)

    # Deeper weight prefetch only when DMA-exposed (small tm, long K) and the
    # extra buffer still fits the VMEM budget.
    w_index = lambda i, j, k: (k, j)
    if (grid[2] >= 4 and tm <= 256
            and _vmem_footprint(tm, tn, tk, in_bytes, out_bytes, w_bufs=3)
            <= vmem_budget):
        w_spec = pl.BlockSpec((tk, tn), w_index, pipeline_mode=pl.Buffered(3))
    else:
        w_spec = pl.BlockSpec((tk, tn), w_index)

    out = pl.pallas_call(
        _fused_linear_kernel,
        out_shape=jax.ShapeDtypeStruct((mp, np_), out_dtype),
        grid_spec=pltpu.PrefetchScalarGridSpec(
            num_scalar_prefetch=0,
            grid=grid,
            in_specs=[
                pl.BlockSpec((tm, tk), lambda i, j, k: (i, k)),   # x tile
                w_spec,                                           # weight.T tile
                pl.BlockSpec((1, tn), lambda i, j, k: (0, j)),    # scale row
                pl.BlockSpec((1, tn), lambda i, j, k: (0, j)),    # bias row
            ],
            out_specs=pl.BlockSpec((tm, tn), lambda i, j, k: (i, j)),
            scratch_shapes=[pltpu.VMEM((tm, tn), jnp.float32)],
        ),
        compiler_params=pltpu.CompilerParams(
            dimension_semantics=("parallel", "parallel", "arbitrary"),
            vmem_limit_bytes=int(vmem_budget)),
    )(x2, w_t, scale_row, bias_row)

    if pad_m or np_ != out_features:
        out = out[:m, :out_features]
    return out.reshape(*lead, out_features)


def fused_linear(x, weight, scale=None, bias=None, *,
                 compute_dtype=jnp.bfloat16, out_dtype=None,
                 tm=None, tn=None, tk=None):
    """One-shot convenience wrapper (prepares the weight on every call).

    For repeated use of the same layer (training / decode loops), call
    prepare_fused_linear() once and reuse fused_linear_prepared() so the
    weight cast+transpose+pad is not re-done per call.
    """
    w_t, s_row, b_row = prepare_fused_linear(
        weight, scale, bias, compute_dtype=compute_dtype)
    return fused_linear_prepared(
        x, w_t, s_row, b_row, weight.shape[0],
        compute_dtype=compute_dtype, out_dtype=out_dtype, tm=tm, tn=tn, tk=tk)


# ---------------------------------------------------------------------------
# Self-test
# ---------------------------------------------------------------------------
if __name__ == "__main__":
    key = jax.random.PRNGKey(0)
    k_x, k_w, k_b, k_x2, k_w2 = jax.random.split(key, 5)

    # ---- Test 1: nicely aligned shapes, prepared (hot-path) API ----------
    batch, seq = 2, 64
    in_features, out_features = 256, 256
    gain = 0.5

    x = jax.random.normal(k_x, (batch, seq, in_features), jnp.float32)
    # FusedLinear init: randn(out, in) / sqrt(in) * gain
    weight = (jax.random.normal(k_w, (out_features, in_features), jnp.float32)
              / math.sqrt(in_features) * gain)
    # The module zero-inits `scale` when zero_init=True (output would be all
    # bias); use a deterministic nonzero scale so the fused path is exercised.
    scale = jnp.linspace(0.5, 1.5, out_features, dtype=jnp.float32)
    bias = 0.1 * jax.random.normal(k_b, (out_features,), jnp.float32)

    w_t, s_row, b_row = prepare_fused_linear(weight, scale, bias)   # once per layer
    out = fused_linear_prepared(x, w_t, s_row, b_row, out_features)
    out = jax.block_until_ready(out)
    assert out.shape == (batch, seq, out_features)

    # Reference with the same MXU numerics (bf16 operands, f32 accumulation).
    ref_mxu = jnp.einsum("bsk,nk->bsn",
                         x.astype(jnp.bfloat16), weight.astype(jnp.bfloat16),
                         preferred_element_type=jnp.float32)
    ref_mxu = ref_mxu * scale[None, None, :] + bias[None, None, :]
    assert jnp.max(jnp.abs(out - ref_mxu)) < 1e-3, "mismatch vs MXU-precision reference"

    # Loose sanity check against the full-f32 PyTorch-equivalent forward.
    ref_f32 = x @ (weight * scale[:, None]).T + bias
    assert jnp.max(jnp.abs(out - ref_f32)) < 5e-2, "mismatch vs f32 reference"

    # bf16 output path (halves writeback).
    out_bf16 = jax.block_until_ready(
        fused_linear_prepared(x, w_t, s_row, b_row, out_features,
                              out_dtype=jnp.bfloat16))
    assert out_bf16.dtype == jnp.bfloat16
    assert jnp.max(jnp.abs(out_bf16.astype(jnp.float32) - out)) < 2e-2

    # scale=None / bias=None path of the module (convenience wrapper).
    out_plain = jax.block_until_ready(fused_linear(x, weight))
    ref_plain = jnp.einsum("bsk,nk->bsn",
                           x.astype(jnp.bfloat16), weight.astype(jnp.bfloat16),
                           preferred_element_type=jnp.float32)
    assert jnp.max(jnp.abs(out_plain - ref_plain)) < 1e-3, "mismatch (no scale/bias)"

    # ---- Test 2: ragged shapes exercise the M/K/N zero-padding path ------
    b2, s2 = 2, 7                       # M = 14 -> padded to 16
    in2, out2 = 200, 192                # K,N -> padded to 256
    x_r = jax.random.normal(k_x2, (b2, s2, in2), jnp.float32)
    w_r = (jax.random.normal(k_w2, (out2, in2), jnp.float32)
           / math.sqrt(in2) * gain)
    out_r = jax.block_until_ready(fused_linear(x_r, w_r))
    assert out_r.shape == (b2, s2, out2)
    ref_r = jnp.einsum("bsk,nk->bsn",
                       x_r.astype(jnp.bfloat16), w_r.astype(jnp.bfloat16),
                       preferred_element_type=jnp.float32)
    assert jnp.max(jnp.abs(out_r - ref_r)) < 1e-3, "mismatch (padded shapes)"

    print("KERNEL_OK")
</pallas_src>

<mosaic_0001>
module attributes {stable_mosaic.version = 11 : i64} {
  func.func @_fused_linear_kernel(%arg0: i32, %arg1: i32, %arg2: i32, %arg3: memref<128x256xbf16, #tpu.memory_space<vmem>>, %arg4: memref<256x256xbf16, #tpu.memory_space<vmem>>, %arg5: memref<1x256xf32, #tpu.memory_space<vmem>>, %arg6: memref<1x256xf32, #tpu.memory_space<vmem>>, %arg7: memref<128x256xf32, #tpu.memory_space<vmem>>, %arg8: memref<128x256xf32, #tpu.memory_space<vmem>>) attributes {dimension_semantics = [#tpu.dimension_semantics<parallel>, #tpu.dimension_semantics<parallel>, #tpu.dimension_semantics<arbitrary>], iteration_bounds = array<i64: 1, 1, 1>, scalar_prefetch = 0 : i64, scratch_operands = 1 : i64, tpu.core_type = #tpu.core_type<tc>, window_params = [{transform_indices = @transform_0, window_bounds = array<i64: 128, 256>}, {transform_indices = @transform_1, window_bounds = array<i64: 256, 256>}, {transform_indices = @transform_2, window_bounds = array<i64: 1, 256>}, {transform_indices = @transform_3, window_bounds = array<i64: 1, 256>}, {transform_indices = @transform_4, window_bounds = array<i64: 128, 256>}]} {
    %c0_i32 = arith.constant 0 : i32
    %0 = arith.cmpi eq, %arg2, %c0_i32 : i32
    %1 = arith.extui %0 : i1 to i32
    %c0_i32_0 = arith.constant 0 : i32
    %2 = arith.cmpi ne, %1, %c0_i32_0 : i32
    scf.if %2 {
      %cst_10 = arith.constant 0.000000e+00 : f32
      %12 = vector.broadcast %cst_10 : f32 to vector<128x256xf32>
      %c0_11 = arith.constant 0 : index
      %c0_12 = arith.constant 0 : index
      %13 = vector.load %arg8[%c0_11, %c0_12] : memref<128x256xf32, #tpu.memory_space<vmem>>, vector<128x256xf32>
      tpu.vector_store %arg8[%c0_11, %c0_12], %12 {strides = array<i32>} : memref<128x256xf32, #tpu.memory_space<vmem>>, vector<128x256xf32>,
    } else {
    }
    %c0 = arith.constant 0 : index
    %c0_1 = arith.constant 0 : index
    %3 = vector.load %arg8[%c0, %c0_1] : memref<128x256xf32, #tpu.memory_space<vmem>>, vector<128x256xf32>
    %c0_2 = arith.constant 0 : index
    %c0_3 = arith.constant 0 : index
    %4 = vector.load %arg3[%c0_2, %c0_3] : memref<128x256xbf16, #tpu.memory_space<vmem>>, vector<128x256xbf16>
    %c0_4 = arith.constant 0 : index
    %c0_5 = arith.constant 0 : index
    %5 = vector.load %arg4[%c0_4, %c0_5] : memref<256x256xbf16, #tpu.memory_space<vmem>>, vector<256x256xbf16>
    %cst = arith.constant dense<0.000000e+00> : vector<128x256xf32>
    %6 = tpu.matmul %4, %5, %cst {dimension_numbers = #tpu.dot_dimension_numbers<[1], [0], [0], [1], [0, 0, 1, 1], [], []>} : vector<128x256xbf16>, vector<256x256xbf16>, vector<128x256xf32> -> vector<128x256xf32>
    %7 = arith.addf %3, %6 : vector<128x256xf32>
    %c0_6 = arith.constant 0 : index
    %c0_7 = arith.constant 0 : index
    %8 = vector.load %arg8[%c0_6, %c0_7] : memref<128x256xf32, #tpu.memory_space<vmem>>, vector<128x256xf32>
    tpu.vector_store %arg8[%c0_6, %c0_7], %7 {strides = array<i32>} : memref<128x256xf32, #tpu.memory_space<vmem>>, vector<128x256xf32>,
    %c0_i32_8 = arith.constant 0 : i32
    %9 = arith.cmpi eq, %arg2, %c0_i32_8 : i32
    %10 = arith.extui %9 : i1 to i32
    %c0_i32_9 = arith.constant 0 : i32
    %11 = arith.cmpi ne, %10, %c0_i32_9 : i32
    scf.if %11 {
      %c0_10 = arith.constant 0 : index
      %c0_11 = arith.constant 0 : index
      %12 = vector.load %arg8[%c0_10, %c0_11] : memref<128x256xf32, #tpu.memory_space<vmem>>, vector<128x256xf32>
      %c0_12 = arith.constant 0 : index
      %c0_13 = arith.constant 0 : index
      %13 = vector.load %arg5[%c0_12, %c0_13] : memref<1x256xf32, #tpu.memory_space<vmem>>, vector<1x256xf32>
      %14 = vector.broadcast %13 : vector<1x256xf32> to vector<128x256xf32>
      %15 = arith.mulf %12, %14 : vector<128x256xf32>
      %c0_14 = arith.constant 0 : index
      %c0_15 = arith.constant 0 : index
      %16 = vector.load %arg6[%c0_14, %c0_15] : memref<1x256xf32, #tpu.memory_space<vmem>>, vector<1x256xf32>
      %17 = vector.broadcast %16 : vector<1x256xf32> to vector<128x256xf32>
      %18 = arith.addf %15, %17 : vector<128x256xf32>
      %c0_16 = arith.constant 0 : index
      %c0_17 = arith.constant 0 : index
      %19 = vector.load %arg7[%c0_16, %c0_17] : memref<128x256xf32, #tpu.memory_space<vmem>>, vector<128x256xf32>
      tpu.vector_store %arg7[%c0_16, %c0_17], %18 {strides = array<i32>} : memref<128x256xf32, #tpu.memory_space<vmem>>, vector<128x256xf32>,
    } else {
    }
    return
  }
  func.func @transform_0(%arg0: i32, %arg1: i32, %arg2: i32) -> (i32, i32) {
    %c0_i32 = arith.constant 0 : i32
    return %arg0, %arg2 : i32, i32
  }
  func.func @transform_1(%arg0: i32, %arg1: i32, %arg2: i32) -> (i32, i32) {
    %c0_i32 = arith.constant 0 : i32
    return %arg2, %arg1 : i32, i32
  }
  func.func @transform_2(%arg0: i32, %arg1: i32, %arg2: i32) -> (i32, i32) {
    %c0_i32 = arith.constant 0 : i32
    %c0_i32_0 = arith.constant 0 : i32
    return %c0_i32, %arg1 : i32, i32
  }
  func.func @transform_3(%arg0: i32, %arg1: i32, %arg2: i32) -> (i32, i32) {
    %c0_i32 = arith.constant 0 : i32
    %c0_i32_0 = arith.constant 0 : i32
    return %c0_i32, %arg1 : i32, i32
  }
  func.func @transform_4(%arg0: i32, %arg1: i32, %arg2: i32) -> (i32, i32) {
    %c0_i32 = arith.constant 0 : i32
    return %arg0, %arg1 : i32, i32
  }
}

</mosaic_0001>

<bundles_post_ra>
// kernel: tpu_custom_call.1
= control target key start
LH: loop header
LB: loop body
LE: loop exit
PB: predicated region body
PF: predicated region fallthrough
CT: control target
= control target key end

     0   :  { %9 = vsyncpa [#allocation4], 0  ;;  %s1228_s0 = inlined_call_operand.hbm [shape: bf16[128,256], index: 0, kind: input, shape index: {}]   ;;  %s1229_s1 = inlined_call_operand.hbm [shape: bf16[256,256], index: 1, kind: input, shape index: {}]   ;;  %s1230_s2 = inlined_call_operand.hbm [shape: f32[1,256], index: 2, kind: input, shape index: {}]   ;;  %s1231_s3 = inlined_call_operand.hbm [shape: f32[1,256], index: 3, kind: input, shape index: {}]   ;;  %s1232_s4 = inlined_call_operand.hbm [shape: f32[128,256], index: 4, kind: output, shape index: {}]  }
   0x1   :  { %10 = vsyncpa [#allocation7], 0 }
   0x2   :  { %11 = vsyncpa [#allocation10], 0 }
   0x3   :  { %12 = vsyncpa [#allocation5], 0  ;;  %s1055_s15 = smov [#allocation6]   ;;  %s1056_s17 = smov [#allocation3]  }
   0x4   :  { %s30_s16 = sshll.u32 %s1055_s15, 4  ;;  %s18_s18 = sshll.u32 %s1056_s17, 4  ;;  %s31_s16 = int_to_ptr.vmem [resolvable:$true] %s30_s16  ;;  %s1089_s18 = int_to_ptr.vmem [resolvable:$true] %s18_s18 }
   0x5   :  { %s937_s21 = scalar_lea.hbm %s1229_s1, 4096 }
   0x6   :  { %p938_p0 = scmp.ne.s32.totalorder %s1229_s1, %s937_s21  ;;  %p941_p1 = scmp.lt.u32.totalorder %s937_s21, %s1229_s1 }
   0x8   :  { %p943_p2 = pnand %p941_p1, %p938_p0 }
   0xa   :  { %946 = shalt.err (!%p943_p2)
}
   0xb   :  { %s947_s26 = scalar_lea.vmem %s31_s16, 4096  ;;  %p952_p4 = scmp.lt.s32.totalorder %s31_s16, %s31_s16 }
   0xc   :  { %p948_p3 = scmp.ne.s32.totalorder %s31_s16, %s947_s26  ;;  %p953_p5 = scmp.lt.s32.totalorder %s947_s26, %s947_s26 }
   0xe   :  { %p954_p6 = por %p953_p5, %p952_p4 }
  0x10   :  { %p955_p7 = pnand %p954_p6, %p948_p3 }
  0x12   :  { %958 = shalt.err (!%p955_p7)
}
  0x13   :  { %s1057_s27 = smov 128   ;;  %s1058_s28 = smov 8  }
  0x14   :  { %36 = dma.hbm_to_vmem [thread:$0]  %s1229_s1, 4096, %s31_s16, [#allocation7], %s1057_s27, %s1057_s27, %s1058_s28  }
  0x15   :  { %s959_s7 = scalar_lea.hbm %s1228_s0, 2048 }
  0x16   :  { %p960_p8 = scmp.ne.s32.totalorder %s1228_s0, %s959_s7  ;;  %p963_p9 = scmp.lt.u32.totalorder %s959_s7, %s1228_s0 }
  0x18   :  { %p965_p10 = pnand %p963_p9, %p960_p8 }
  0x1a   :  { %968 = shalt.err (!%p965_p10)
}
  0x1b   :  { %s969_s12 = scalar_lea.vmem %s1089_s18, 2048  ;;  %p974_p12 = scmp.lt.s32.totalorder %s1089_s18, %s1089_s18 }
  0x1c   :  { %p970_p11 = scmp.ne.s32.totalorder %s1089_s18, %s969_s12  ;;  %p975_p13 = scmp.lt.s32.totalorder %s969_s12, %s969_s12 }
  0x1e   :  { %p976_p0 = por %p975_p13, %p974_p12 }
  0x20   :  { %p977_p1 = pnand %p976_p0, %p970_p11 }
  0x22   :  { %980 = shalt.err (!%p977_p1)
}
  0x23   :  { %24 = dma.hbm_to_vmem [thread:$0]  %s1228_s0, 2048, %s1089_s18, [#allocation4], %s1057_s27, %s1057_s27, %s1058_s28  }
  0x24   :  { %s1059_s14 = smov [#allocation8]   ;;  %s1060_s16 = smov [#allocation9]  }
  0x25   :  { %s43_s15 = sshll.u32 %s1059_s14, 4  ;;  %s53_s17 = sshll.u32 %s1060_s16, 4  ;;  %s44_s15 = int_to_ptr.vmem [resolvable:$true] %s43_s15  ;;  %s54_s17 = int_to_ptr.vmem [resolvable:$true] %s53_s17 }
  0x26   :  { %s981_s21 = scalar_lea.hbm %s1230_s2, 32 }
  0x27   :  { %p982_p2 = scmp.ne.s32.totalorder %s1230_s2, %s981_s21  ;;  %p985_p3 = scmp.lt.u32.totalorder %s981_s21, %s1230_s2 }
  0x29   :  { %p987_p4 = pnand %p985_p3, %p982_p2 }
  0x2b   :  { %990 = shalt.err (!%p987_p4)
}
  0x2c   :  { %s991_s0 = scalar_lea.vmem %s44_s15, 32  ;;  %p996_p6 = scmp.lt.s32.totalorder %s44_s15, %s44_s15 }
  0x2d   :  { %p992_p5 = scmp.ne.s32.totalorder %s44_s15, %s991_s0  ;;  %p997_p7 = scmp.lt.s32.totalorder %s991_s0, %s991_s0 }
  0x2f   :  { %p998_p8 = por %p997_p7, %p996_p6 }
  0x31   :  { %p999_p9 = pnand %p998_p8, %p992_p5 }
  0x33   :  { %1002 = shalt.err (!%p999_p9)
}
  0x34   :  { %46 = dma.hbm_to_vmem [thread:$0]  %s1230_s2, 32, %s44_s15, [#allocation7]  }
  0x35   :  { %s1003_s29 = scalar_lea.hbm %s1231_s3, 32 }
  0x36   :  { %p1004_p10 = scmp.ne.s32.totalorder %s1231_s3, %s1003_s29  ;;  %p1007_p11 = scmp.lt.u32.totalorder %s1003_s29, %s1231_s3 }
  0x38   :  { %p1009_p12 = pnand %p1007_p11, %p1004_p10 }
  0x3a   :  { %1012 = shalt.err (!%p1009_p12)
}
  0x3b   :  { %s1013_s8 = scalar_lea.vmem %s54_s17, 32  ;;  %p1018_p0 = scmp.lt.s32.totalorder %s54_s17, %s54_s17 }
  0x3c   :  { %p1014_p13 = scmp.ne.s32.totalorder %s54_s17, %s1013_s8  ;;  %p1019_p1 = scmp.lt.s32.totalorder %s1013_s8, %s1013_s8 }
  0x3e   :  { %p1020_p2 = por %p1019_p1, %p1018_p0 }
  0x40   :  { %p1021_p3 = pnand %p1020_p2, %p1014_p13 }
  0x42   :  { %1024 = shalt.err (!%p1021_p3)
}
  0x43   :  { %56 = dma.hbm_to_vmem [thread:$0]  %s1231_s3, 32, %s54_s17, [#allocation10]  }
  0x44   :  { %1047 = dma.done.wait [#allocation4], 2048  }
  0x45   :  { %1048 = vsyncadd [#allocation4], 4294965248 }
  0x46   :  { %1049 = dma.done.wait [#allocation7], 4128  }
  0x47   :  { %1050 = vsyncadd [#allocation7], 4294963168 }
  0x48   :  { %1051 = dma.done.wait [#allocation10], 32  }
  0x49   :  { %1052 = vsyncadd [#allocation10], 4294967264  ;;  %v865_v0 = vld [vmem:[#allocation6 + $0x4] ss:$8 sps:$4 sm:$0xff]   ;;  %v867_v1 = vld [vmem:[#allocation6] ss:$8 sps:$4 sm:$0xff]   ;;  %v639_v48 = vlaneseq }
  0x4a   :  { %425 = vmatprep.subr.bf16.mxu0 %v865_v0  ;;  %824 = vmatprep.subr.bf16.mxu1 %v865_v0  ;;  %v868_v2 = vld [vmem:[#allocation6 + $0x14] ss:$8 sps:$4 sm:$0xff]   ;;  %v870_v3 = vld [vmem:[#allocation6 + $0x10] ss:$8 sps:$4 sm:$0xff]   ;;  %v871_v4 = vld [vmem:[#allocation6 + $0x24] ss:$8 sps:$4 sm:$0xff]  }
  0x4b   :  { %426 = vmatpush1.bf16.msra.mxu0 %v867_v1  ;;  %840 = vmatpush1.bf16.msra.mxu1 %v867_v1  ;;  %v873_v5 = vld [vmem:[#allocation6 + $0x20] ss:$8 sps:$4 sm:$0xff]   ;;  %v874_v6 = vld [vmem:[#allocation6 + $0x34] ss:$8 sps:$4 sm:$0xff]   ;;  %v876_v7 = vld [vmem:[#allocation6 + $0x30] ss:$8 sps:$4 sm:$0xff]  }
  0x4c   :  { %427 = vmatprep.subr.bf16.mxu0 %v868_v2  ;;  %825 = vmatprep.subr.bf16.mxu1 %v868_v2  ;;  %v877_v8 = vld [vmem:[#allocation6 + $0x44] ss:$8 sps:$4 sm:$0xff]   ;;  %v879_v9 = vld [vmem:[#allocation6 + $0x40] ss:$8 sps:$4 sm:$0xff]   ;;  %v880_v10 = vld [vmem:[#allocation6 + $0x54] ss:$8 sps:$4 sm:$0xff]  }
  0x4d   :  { %v882_v11 = vld [vmem:[#allocation6 + $0x50] ss:$8 sps:$4 sm:$0xff]   ;;  %v883_v12 = vld [vmem:[#allocation6 + $0x64] ss:$8 sps:$4 sm:$0xff]   ;;  %v885_v14 = vld [vmem:[#allocation6 + $0x60] ss:$8 sps:$4 sm:$0xff]  }
  0x4e   :  { %v915_v13 = vld [vmem:[#allocation3 + $0x4] ss:$8 sps:$4 sm:$0xff]   ;;  %v886_v16 = vld [vmem:[#allocation6 + $0x74] ss:$8 sps:$4 sm:$0xff]   ;;  %v888_v17 = vld [vmem:[#allocation6 + $0x70] ss:$8 sps:$4 sm:$0xff]  }
  0x4f   :  { %428 = vmatpush1.bf16.msra.mxu0 %v870_v3  ;;  %841 = vmatpush1.bf16.msra.mxu1 %v870_v3  ;;  %v918_v15 = vld [vmem:[#allocation3 + $0x44] ss:$8 sps:$4 sm:$0xff]   ;;  %v891_v19 = vld [vmem:[#allocation6 + $0x80] ss:$8 sps:$4 sm:$0xff]   ;;  %v892_v20 = vld [vmem:[#allocation6 + $0x94] ss:$8 sps:$4 sm:$0xff]  }
  0x50   :  { %429 = vmatprep.subr.bf16.mxu0 %v871_v4  ;;  %826 = vmatprep.subr.bf16.mxu1 %v871_v4  ;;  %v889_v18 = vld [vmem:[#allocation6 + $0x84] ss:$8 sps:$4 sm:$0xff]   ;;  %v894_v21 = vld [vmem:[#allocation6 + $0x90] ss:$8 sps:$4 sm:$0xff]   ;;  %v897_v23 = vld [vmem:[#allocation6 + $0xa0] ss:$8 sps:$4 sm:$0xff]  }
  0x51   :  { %457 = vmatprep.mubr.bf16.mxu0 %v915_v13  ;;  %497 = vmatprep.mubr.bf16.mxu1 %v918_v15  ;;  %v895_v22 = vld [vmem:[#allocation6 + $0xa4] ss:$8 sps:$4 sm:$0xff]   ;;  %v898_v24 = vld [vmem:[#allocation6 + $0xb4] ss:$8 sps:$4 sm:$0xff]   ;;  %v900_v25 = vld [vmem:[#allocation6 + $0xb0] ss:$8 sps:$4 sm:$0xff]  }
  0x52   :  { %v901_v26 = vld [vmem:[#allocation6 + $0xc4] ss:$8 sps:$4 sm:$0xff]   ;;  %v903_v27 = vld [vmem:[#allocation6 + $0xc0] ss:$8 sps:$4 sm:$0xff]   ;;  %v904_v28 = vld [vmem:[#allocation6 + $0xd4] ss:$8 sps:$4 sm:$0xff]  }
  0x53   :  { %430 = vmatpush1.bf16.msra.mxu0 %v873_v5  ;;  %842 = vmatpush1.bf16.msra.mxu1 %v873_v5  ;;  %v906_v29 = vld [vmem:[#allocation6 + $0xd0] ss:$8 sps:$4 sm:$0xff]   ;;  %v907_v30 = vld [vmem:[#allocation6 + $0xe4] ss:$8 sps:$4 sm:$0xff]   ;;  %v909_v31 = vld [vmem:[#allocation6 + $0xe0] ss:$8 sps:$4 sm:$0xff]  }
  0x54   :  { %431 = vmatprep.subr.bf16.mxu0 %v874_v6  ;;  %827 = vmatprep.subr.bf16.mxu1 %v874_v6  ;;  %v910_v32 = vld [vmem:[#allocation6 + $0xf4] ss:$8 sps:$4 sm:$0xff]   ;;  %v912_v33 = vld [vmem:[#allocation6 + $0xf0] ss:$8 sps:$4 sm:$0xff]   ;;  %v913_v34 = vld [vmem:[#allocation3] ss:$8 sps:$4 sm:$0xff]  }
  0x55   :  { %v916_v35 = vld [vmem:[#allocation3 + $0x40] ss:$8 sps:$4 sm:$0xff]   ;;  %v919_v36 = vld [vmem:[#allocation3 + $0x14] ss:$8 sps:$4 sm:$0xff]   ;;  %v923_v38 = vld [vmem:[#allocation3 + $0x10] ss:$8 sps:$4 sm:$0xff]  }
  0x56   :  { %v921_v37 = vld [vmem:[#allocation3 + $0x54] ss:$8 sps:$4 sm:$0xff]   ;;  %v924_v39 = vld [vmem:[#allocation3 + $0x50] ss:$8 sps:$4 sm:$0xff]   ;;  %v925_v40 = vld [vmem:[#allocation3 + $0x24] ss:$8 sps:$4 sm:$0xff]  }
  0x57   :  { %432 = vmatpush1.bf16.msra.mxu0 %v876_v7  ;;  %843 = vmatpush1.bf16.msra.mxu1 %v876_v7  ;;  %v927_v41 = vld [vmem:[#allocation3 + $0x64] ss:$8 sps:$4 sm:$0xff]   ;;  %v929_v42 = vld [vmem:[#allocation3 + $0x20] ss:$8 sps:$4 sm:$0xff]   ;;  %v931_v44 = vld [vmem:[#allocation3 + $0x34] ss:$8 sps:$4 sm:$0xff]  }
  0x58   :  { %433 = vmatprep.subr.bf16.mxu0 %v877_v8  ;;  %828 = vmatprep.subr.bf16.mxu1 %v877_v8  ;;  %v930_v43 = vld [vmem:[#allocation3 + $0x60] ss:$8 sps:$4 sm:$0xff]   ;;  %v933_v45 = vld [vmem:[#allocation3 + $0x74] ss:$8 sps:$4 sm:$0xff]   ;;  %v935_v46 = vld [vmem:[#allocation3 + $0x30] ss:$8 sps:$4 sm:$0xff]  }
  0x59   :  { %v936_v47 = vld [vmem:[#allocation3 + $0x70] ss:$8 sps:$4 sm:$0xff]   ;;  %v640_v49 = vshrl.u32 %v639_v48, 7  ;;  %v637_v51 = vld [vmem:[#allocation8] sm:$0x3]  ;;  %s1061_s3 = smov [#allocation11]  }
  0x5a   :  { %v681_v53 = vld [vmem:[#allocation9] sm:$0x3]  ;;  %s762_s10 = sshll.u32 %s1061_s3, 4  ;;  %s763_s10 = int_to_ptr.vmem [resolvable:$true] %s762_s10 }
  0x5b   :  { %434 = vmatpush1.bf16.msra.mxu0 %v879_v9  ;;  %844 = vmatpush1.bf16.msra.mxu1 %v879_v9  ;;  %v641_v50 = vsub.s32 0, %v640_v49  ;;  %v645_v52 = vsub.s32 1, %v640_v49  ;;  %s1025_s11 = scalar_lea.vmem %s763_s10, 4096  ;;  %p1030_p5 = scmp.lt.s32.totalorder %s763_s10, %s763_s10 }
  0x5c   :  { %435 = vmatprep.subr.bf16.mxu0 %v880_v10  ;;  %829 = vmatprep.subr.bf16.mxu1 %v880_v10  ;;  %p1026_p4 = scmp.ne.s32.totalorder %s763_s10, %s1025_s11  ;;  %p1031_p6 = scmp.lt.s32.totalorder %s1025_s11, %s1025_s11 }
  0x5d   :  { %v1144_v54 = vrot.slane %v637_v51, %v641_v50  ;;  %v1146_v55 = vrot.slane %v637_v51, %v645_v52  ;;  %v1148_v56 = vrot.slane %v681_v53, %v641_v50  ;;  %v1150_v59 = vrot.slane %v681_v53, %v645_v52 }
  0x5e   :  { %p1032_p7 = por %p1031_p6, %p1030_p5 }
  0x5f   :  { %436 = vmatpush1.bf16.msra.mxu0 %v882_v11  ;;  %845 = vmatpush1.bf16.msra.mxu1 %v882_v11 }
  0x60   :  { %437 = vmatprep.subr.bf16.mxu0 %v883_v12  ;;  %830 = vmatprep.subr.bf16.mxu1 %v883_v12  ;;  %p1033_p8 = pnand %p1032_p7, %p1026_p4 }
  0x63   :  { %438 = vmatpush1.bf16.msra.mxu0 %v885_v14  ;;  %846 = vmatpush1.bf16.msra.mxu1 %v885_v14 }
  0x64   :  { %439 = vmatprep.subr.bf16.mxu0 %v886_v16  ;;  %831 = vmatprep.subr.bf16.mxu1 %v886_v16 }
  0x67   :  { %440 = vmatpush1.bf16.msra.mxu0 %v888_v17  ;;  %847 = vmatpush1.bf16.msra.mxu1 %v888_v17 }
  0x68   :  { %441 = vmatprep.subr.bf16.mxu0 %v889_v18  ;;  %832 = vmatprep.subr.bf16.mxu1 %v889_v18 }
  0x6b   :  { %442 = vmatpush1.bf16.msra.mxu0 %v891_v19  ;;  %848 = vmatpush1.bf16.msra.mxu1 %v891_v19 }
  0x6c   :  { %443 = vmatprep.subr.bf16.mxu0 %v892_v20  ;;  %833 = vmatprep.subr.bf16.mxu1 %v892_v20 }
  0x6f   :  { %444 = vmatpush1.bf16.msra.mxu0 %v894_v21  ;;  %849 = vmatpush1.bf16.msra.mxu1 %v894_v21 }
  0x70   :  { %445 = vmatprep.subr.bf16.mxu0 %v895_v22  ;;  %834 = vmatprep.subr.bf16.mxu1 %v895_v22 }
  0x73   :  { %446 = vmatpush1.bf16.msra.mxu0 %v897_v23  ;;  %850 = vmatpush1.bf16.msra.mxu1 %v897_v23 }
  0x74   :  { %447 = vmatprep.subr.bf16.mxu0 %v898_v24  ;;  %835 = vmatprep.subr.bf16.mxu1 %v898_v24 }
  0x77   :  { %448 = vmatpush1.bf16.msra.mxu0 %v900_v25  ;;  %851 = vmatpush1.bf16.msra.mxu1 %v900_v25 }
  0x78   :  { %449 = vmatprep.subr.bf16.mxu0 %v901_v26  ;;  %836 = vmatprep.subr.bf16.mxu1 %v901_v26 }
  0x7b   :  { %450 = vmatpush1.bf16.msra.mxu0 %v903_v27  ;;  %852 = vmatpush1.bf16.msra.mxu1 %v903_v27 }
  0x7c   :  { %451 = vmatprep.subr.bf16.mxu0 %v904_v28  ;;  %837 = vmatprep.subr.bf16.mxu1 %v904_v28 }
  0x7f   :  { %452 = vmatpush1.bf16.msra.mxu0 %v906_v29  ;;  %853 = vmatpush1.bf16.msra.mxu1 %v906_v29 }
  0x80   :  { %453 = vmatprep.subr.bf16.mxu0 %v907_v30  ;;  %838 = vmatprep.subr.bf16.mxu1 %v907_v30 }
  0x83   :  { %454 = vmatpush1.bf16.msra.mxu0 %v909_v31  ;;  %854 = vmatpush1.bf16.msra.mxu1 %v909_v31 }
  0x84   :  { %455 = vmatprep.subr.bf16.mxu0 %v910_v32  ;;  %839 = vmatprep.subr.bf16.mxu1 %v910_v32 }
  0x87   :  { %456 = vmatpush1.bf16.msra.mxu0 %v912_v33  ;;  %855 = vmatpush1.bf16.msra.mxu1 %v912_v33 }
  0x8a   :  { %458 = vmatmul.mubr.bf16.vlgmr.msra.gmra.mrb[0].mxu0 %v913_v34  ;;  %498 = vmatmul.mubr.bf16.vlgmr.msra.gmra.mrb[0].mxu1 %v916_v35 }
  0x8b   :  { %467 = vmatprep.mubr.bf16.mxu0 %v919_v36  ;;  %507 = vmatprep.mubr.bf16.mxu1 %v921_v37 }
  0x92   :  { %468 = vmatmul.mubr.bf16.gmra.mrb[4].mxu0 %v923_v38  ;;  %508 = vmatmul.mubr.bf16.gmra.mrb[4].mxu1 %v924_v39 }
  0x93   :  { %477 = vmatprep.mubr.bf16.mxu0 %v925_v40  ;;  %517 = vmatprep.mubr.bf16.mxu1 %v927_v41 }
  0x9a   :  { %478 = vmatmul.mubr.bf16.gmra.mrb[8].mxu0 %v929_v42  ;;  %518 = vmatmul.mubr.bf16.gmra.mrb[8].mxu1 %v930_v43 }
  0x9b   :  { %487 = vmatprep.mubr.bf16.mxu0 %v931_v44  ;;  %527 = vmatprep.mubr.bf16.mxu1 %v933_v45 }
  0xa2   :  { %488 = vmatmul.mubr.bf16.gmra.mrb[12].mxu0 %v935_v46  ;;  %528 = vmatmul.mubr.bf16.gmra.mrb[12].mxu1 %v936_v47 }
 0x15d   :  { %v459_v57 = vpop.f32.mrb[0].mxu0  ;;  %v499_v58 = vpop.f32.mrb[0].mxu1 }
 0x15e   :  { %v649_v60 = vmul.f32 %v1144_v54, %v459_v57  ;;  %v665_v61 = vmul.f32 %v1144_v54, %v499_v58  ;;  %v461_v62 = vpop.f32.mrb[1].mxu0  ;;  %v501_v63 = vpop.f32.mrb[1].mxu1 }
 0x15f   :  { %v650_v0 = vmul.f32 %v1146_v55, %v461_v62  ;;  %v666_v1 = vmul.f32 %v1146_v55, %v501_v63  ;;  %v463_v2 = vpop.f32.mrb[2].mxu0  ;;  %v503_v3 = vpop.f32.mrb[2].mxu1 }
 0x160   :  { %v693_v4 = vadd.f32 %v1148_v56, %v649_v60  ;;  %v709_v5 = vadd.f32 %v1148_v56, %v665_v61  ;;  %v651_v6 = vmul.f32 %v1144_v54, %v463_v2  ;;  %v667_v7 = vmul.f32 %v1144_v54, %v503_v3  ;;  %v465_v8 = vpop.f32.mrb[3].mxu0  ;;  %v505_v9 = vpop.f32.mrb[3].mxu1 }
 0x161   :  { %v694_v10 = vadd.f32 %v1150_v59, %v650_v0  ;;  %v710_v11 = vadd.f32 %v1150_v59, %v666_v1  ;;  %v652_v12 = vmul.f32 %v1146_v55, %v465_v8  ;;  %v668_v13 = vmul.f32 %v1146_v55, %v505_v9 }
 0x162   :  { %725 = vst [vmem:[#allocation11] sm:$0xff] %v693_v4  ;;  %741 = vst [vmem:[#allocation11 + $0x80] sm:$0xff] %v709_v5  ;;  %v695_v14 = vadd.f32 %v1148_v56, %v651_v6  ;;  %v711_v15 = vadd.f32 %v1148_v56, %v667_v7 }
 0x163   :  { %726 = vst [vmem:[#allocation11 + $0x8] sm:$0xff] %v694_v10  ;;  %742 = vst [vmem:[#allocation11 + $0x88] sm:$0xff] %v710_v11  ;;  %v696_v16 = vadd.f32 %v1150_v59, %v652_v12  ;;  %v712_v17 = vadd.f32 %v1150_v59, %v668_v13 }
 0x164   :  { %727 = vst [vmem:[#allocation11 + $0x10] sm:$0xff] %v695_v14  ;;  %743 = vst [vmem:[#allocation11 + $0x90] sm:$0xff] %v711_v15 }
 0x165   :  { %728 = vst [vmem:[#allocation11 + $0x18] sm:$0xff] %v696_v16  ;;  %744 = vst [vmem:[#allocation11 + $0x98] sm:$0xff] %v712_v17  ;;  %v469_v18 = vpop.f32.mrb[4].mxu0  ;;  %v509_v19 = vpop.f32.mrb[4].mxu1 }
 0x166   :  { %v653_v20 = vmul.f32 %v1144_v54, %v469_v18  ;;  %v669_v21 = vmul.f32 %v1144_v54, %v509_v19  ;;  %v471_v22 = vpop.f32.mrb[5].mxu0  ;;  %v511_v23 = vpop.f32.mrb[5].mxu1 }
 0x167   :  { %v654_v24 = vmul.f32 %v1146_v55, %v471_v22  ;;  %v670_v25 = vmul.f32 %v1146_v55, %v511_v23  ;;  %v473_v26 = vpop.f32.mrb[6].mxu0  ;;  %v513_v27 = vpop.f32.mrb[6].mxu1 }
 0x168   :  { %v697_v28 = vadd.f32 %v1148_v56, %v653_v20  ;;  %v713_v29 = vadd.f32 %v1148_v56, %v669_v21  ;;  %v655_v30 = vmul.f32 %v1144_v54, %v473_v26  ;;  %v671_v31 = vmul.f32 %v1144_v54, %v513_v27  ;;  %v475_v32 = vpop.f32.mrb[7].mxu0  ;;  %v515_v33 = vpop.f32.mrb[7].mxu1 }
 0x169   :  { %v698_v34 = vadd.f32 %v1150_v59, %v654_v24  ;;  %v714_v35 = vadd.f32 %v1150_v59, %v670_v25  ;;  %v656_v36 = vmul.f32 %v1146_v55, %v475_v32  ;;  %v672_v37 = vmul.f32 %v1146_v55, %v515_v33 }
 0x16a   :  { %729 = vst [vmem:[#allocation11 + $0x20] sm:$0xff] %v697_v28  ;;  %745 = vst [vmem:[#allocation11 + $0xa0] sm:$0xff] %v713_v29  ;;  %v699_v38 = vadd.f32 %v1148_v56, %v655_v30  ;;  %v715_v39 = vadd.f32 %v1148_v56, %v671_v31 }
 0x16b   :  { %730 = vst [vmem:[#allocation11 + $0x28] sm:$0xff] %v698_v34  ;;  %746 = vst [vmem:[#allocation11 + $0xa8] sm:$0xff] %v714_v35  ;;  %v700_v40 = vadd.f32 %v1150_v59, %v656_v36  ;;  %v716_v41 = vadd.f32 %v1150_v59, %v672_v37 }
 0x16c   :  { %731 = vst [vmem:[#allocation11 + $0x30] sm:$0xff] %v699_v38  ;;  %747 = vst [vmem:[#allocation11 + $0xb0] sm:$0xff] %v715_v39 }
 0x16d   :  { %732 = vst [vmem:[#allocation11 + $0x38] sm:$0xff] %v700_v40  ;;  %748 = vst [vmem:[#allocation11 + $0xb8] sm:$0xff] %v716_v41  ;;  %v479_v42 = vpop.f32.mrb[8].mxu0  ;;  %v519_v43 = vpop.f32.mrb[8].mxu1 }
 0x16e   :  { %v657_v44 = vmul.f32 %v1144_v54, %v479_v42  ;;  %v673_v45 = vmul.f32 %v1144_v54, %v519_v43  ;;  %v481_v46 = vpop.f32.mrb[9].mxu0  ;;  %v521_v47 = vpop.f32.mrb[9].mxu1 }
 0x16f   :  { %v658_v48 = vmul.f32 %v1146_v55, %v481_v46  ;;  %v674_v49 = vmul.f32 %v1146_v55, %v521_v47  ;;  %v483_v50 = vpop.f32.mrb[10].mxu0  ;;  %v523_v51 = vpop.f32.mrb[10].mxu1 }
 0x170   :  { %v701_v52 = vadd.f32 %v1148_v56, %v657_v44  ;;  %v717_v53 = vadd.f32 %v1148_v56, %v673_v45  ;;  %v659_v57 = vmul.f32 %v1144_v54, %v483_v50  ;;  %v675_v58 = vmul.f32 %v1144_v54, %v523_v51  ;;  %v485_v60 = vpop.f32.mrb[11].mxu0  ;;  %v525_v61 = vpop.f32.mrb[11].mxu1 }
 0x171   :  { %v702_v62 = vadd.f32 %v1150_v59, %v658_v48  ;;  %v718_v63 = vadd.f32 %v1150_v59, %v674_v49  ;;  %v660_v0 = vmul.f32 %v1146_v55, %v485_v60  ;;  %v676_v1 = vmul.f32 %v1146_v55, %v525_v61 }
 0x172   :  { %733 = vst [vmem:[#allocation11 + $0x40] sm:$0xff] %v701_v52  ;;  %749 = vst [vmem:[#allocation11 + $0xc0] sm:$0xff] %v717_v53  ;;  %v703_v2 = vadd.f32 %v1148_v56, %v659_v57  ;;  %v719_v3 = vadd.f32 %v1148_v56, %v675_v58 }
 0x173   :  { %734 = vst [vmem:[#allocation11 + $0x48] sm:$0xff] %v702_v62  ;;  %750 = vst [vmem:[#allocation11 + $0xc8] sm:$0xff] %v718_v63  ;;  %v704_v4 = vadd.f32 %v1150_v59, %v660_v0  ;;  %v720_v5 = vadd.f32 %v1150_v59, %v676_v1 }
 0x174   :  { %735 = vst [vmem:[#allocation11 + $0x50] sm:$0xff] %v703_v2  ;;  %751 = vst [vmem:[#allocation11 + $0xd0] sm:$0xff] %v719_v3 }
 0x175   :  { %736 = vst [vmem:[#allocation11 + $0x58] sm:$0xff] %v704_v4  ;;  %752 = vst [vmem:[#allocation11 + $0xd8] sm:$0xff] %v720_v5  ;;  %v489_v6 = vpop.f32.mrb[12].mxu0  ;;  %v529_v7 = vpop.f32.mrb[12].mxu1 }
 0x176   :  { %v661_v8 = vmul.f32 %v1144_v54, %v489_v6  ;;  %v677_v9 = vmul.f32 %v1144_v54, %v529_v7  ;;  %v491_v10 = vpop.f32.mrb[13].mxu0  ;;  %v531_v11 = vpop.f32.mrb[13].mxu1 }
 0x177   :  { %v662_v12 = vmul.f32 %v1146_v55, %v491_v10  ;;  %v678_v13 = vmul.f32 %v1146_v55, %v531_v11  ;;  %v493_v14 = vpop.f32.mrb[14].mxu0  ;;  %v533_v15 = vpop.f32.mrb[14].mxu1 }
 0x178   :  { %v705_v16 = vadd.f32 %v1148_v56, %v661_v8  ;;  %v721_v17 = vadd.f32 %v1148_v56, %v677_v9  ;;  %v663_v18 = vmul.f32 %v1144_v54, %v493_v14  ;;  %v679_v19 = vmul.f32 %v1144_v54, %v533_v15  ;;  %v495_v20 = vpop.f32.mrb[15].mxu0  ;;  %v535_v21 = vpop.f32.mrb[15].mxu1 }
 0x179   :  { %v706_v22 = vadd.f32 %v1150_v59, %v662_v12  ;;  %v722_v23 = vadd.f32 %v1150_v59, %v678_v13  ;;  %v664_v24 = vmul.f32 %v1146_v55, %v495_v20  ;;  %v680_v25 = vmul.f32 %v1146_v55, %v535_v21 }
 0x17a   :  { %737 = vst [vmem:[#allocation11 + $0x60] sm:$0xff] %v705_v16  ;;  %753 = vst [vmem:[#allocation11 + $0xe0] sm:$0xff] %v721_v17  ;;  %v707_v26 = vadd.f32 %v1148_v56, %v663_v18  ;;  %v723_v27 = vadd.f32 %v1148_v56, %v679_v19 }
 0x17b   :  { %738 = vst [vmem:[#allocation11 + $0x68] sm:$0xff] %v706_v22  ;;  %754 = vst [vmem:[#allocation11 + $0xe8] sm:$0xff] %v722_v23  ;;  %v708_v54 = vadd.f32 %v1150_v59, %v664_v24  ;;  %v724_v28 = vadd.f32 %v1150_v59, %v680_v25 }
 0x17c   :  { %739 = vst [vmem:[#allocation11 + $0x70] sm:$0xff] %v707_v26  ;;  %755 = vst [vmem:[#allocation11 + $0xf0] sm:$0xff] %v723_v27 }
 0x17d   :  { %740 = vst [vmem:[#allocation11 + $0x78] sm:$0xff] %v708_v54  ;;  %756 = vst [vmem:[#allocation11 + $0xf8] sm:$0xff] %v724_v28 }
 0x17e   :  { %1036 = shalt.err (!%p1033_p8)
}
 0x17f   :  { %s1037_s13 = scalar_lea.hbm %s1232_s4, 4096 }
 0x180   :  { %p1038_p9 = scmp.ne.s32.totalorder %s1232_s4, %s1037_s13  ;;  %p1041_p10 = scmp.lt.u32.totalorder %s1037_s13, %s1232_s4 }
 0x182   :  { %p1043_p11 = pnand %p1041_p10, %p1038_p9 }
 0x184   :  { %1046 = shalt.err (!%p1043_p11)
}
 0x185   :  { %s1062_s19 = smov 256   ;;  %s1063_s20 = smov 16  }
 0x186   :  { %768 = dma.vmem_to_hbm [thread:$0]  %s763_s10, 4096, %s1232_s4, [#allocation5], %s1062_s19, %s1062_s19, %s1063_s20  }
 0x187   :  { %1053 = dma.done.wait [#allocation5], 4096  }
 0x188   :  { %1054 = vsyncadd [#allocation5], 4294963200 }
 0x189   :  { %772 = vsyncpa [#allocation4], 1 }
 0x18a   :  { %773 = vsyncpa [#allocation7], 1 }
 0x18b   :  { %774 = vsyncpa [#allocation10], 1 }
 0x18c   :  { %775 = vsyncpa [#allocation5], 1 }

</bundles_post_ra>
